<compile_context>
chip_gen: v7x
topology: tpu7x:2x2x1
jax: 0.10.0
libtpu: 0.0.40
codegen_flags: <defaults>
</compile_context>

<pallas_src>
import math

import jax
import jax.numpy as jnp
from jax.experimental import pallas as pl
from jax.experimental.pallas import tpu as pltpu


def _drop_path_kernel(scale_ref, x_ref, o_ref):
    # scale_ref: (TB, 1) float32 per-sample scale tile
    # x_ref/o_ref: (TB, TC) tile of the flattened (B, F) input/output
    s = scale_ref[...]                           # (TB, 1) f32
    xv = x_ref[...].astype(jnp.float32)          # (TB, TC) f32
    o_ref[...] = (xv * s).astype(o_ref.dtype)    # lane-broadcast multiply


def _choose_tiles(B, F, itemsize):
    """Pick (TB, TC) obeying the (sublane, 128) tiling rule with ~2 MiB blocks."""
    target_block_bytes = 2 * 1024 * 1024  # safe for v7x (64 MiB VMEM), big enough for v5e/v6e
    sub = {4: 8, 2: 16, 1: 32}.get(itemsize, 8)

    # Lane (last) dim: multiple of 128, or the full extent.
    if F % 128 == 0:
        TC = min(F, 32 * 1024)  # lane-dense: large multiple of 128
    else:
        TC = F                  # full extent satisfies the tiling rule

    # Sublane (second-to-last) dim: multiple of `sub`, or the full batch.
    rows_for_target = max(1, target_block_bytes // max(1, TC * itemsize))
    if B % sub == 0:
        TB = min(B, max(sub, (rows_for_target // sub) * sub))
    else:
        TB = B
    return TB, TC


def drop_path_pallas(x, drop_prob: float = 0.0, training: bool = False, *, key=None):
    """Pallas implementation of timm-style drop_path; x is (B, ...)."""
    if drop_prob == 0.0 or not training:
        return x
    if key is None:
        raise ValueError("drop_path_pallas: a PRNG `key` is required when "
                         "training=True and drop_prob > 0.")

    keep_prob = 1.0 - drop_prob
    orig_shape = x.shape
    B = orig_shape[0]
    F = int(math.prod(orig_shape[1:])) if x.ndim > 1 else 1

    # Per-sample keep mask, computed in float32 (avoids low-precision bias in
    # both the keep probability and the 1/keep_prob scale).
    r = jax.random.uniform(key, (B,), dtype=jnp.float32)
    mask = jnp.floor(jnp.float32(keep_prob) + r)
    scale2d = (mask / jnp.float32(keep_prob)).reshape(B, 1)  # (B, 1) f32

    x2 = x.reshape(B, F)
    itemsize = jnp.dtype(x.dtype).itemsize
    TB, TC = _choose_tiles(B, F, itemsize)
    grid = (pl.cdiv(B, TB), pl.cdiv(F, TC))

    out2 = pl.pallas_call(
        _drop_path_kernel,
        out_shape=jax.ShapeDtypeStruct((B, F), x.dtype),
        grid=grid,
        in_specs=[
            pl.BlockSpec((TB, 1), lambda i, j: (i, 0)),   # per-sample scales
            pl.BlockSpec((TB, TC), lambda i, j: (i, j)),  # x tile
        ],
        out_specs=pl.BlockSpec((TB, TC), lambda i, j: (i, j)),
        # x is input index 1 (after scale); alias it with output 0.  Copy-free
        # only when the caller donates x (e.g. jit(..., donate_argnums=...)).
        input_output_aliases={1: 0},
        compiler_params=pltpu.CompilerParams(
            dimension_semantics=("parallel", "parallel"),
            vmem_limit_bytes=32 * 1024 * 1024,
        ),
    )(scale2d, x2)

    return out2.reshape(orig_shape)


class DropPath:
    """Mirror of the nn.Module: holds drop_prob; forward(x, training, key)."""

    def __init__(self, drop_prob=None):
        self.drop_prob = 0.0 if drop_prob is None else float(drop_prob)

    def __call__(self, x, *, training: bool = False, key=None):
        return drop_path_pallas(x, self.drop_prob, training, key=key)


if __name__ == "__main__":
    root = jax.random.PRNGKey(0)
    k_x, k_drop = jax.random.split(root)

    B, N, D = 2, 8, 32
    x = jax.random.normal(k_x, (B, N, D), dtype=jnp.float32)

    module = DropPath(drop_prob=0.25)

    # Eval / identity path
    y_eval = module(x, training=False)
    jax.block_until_ready(y_eval)
    assert jnp.array_equal(y_eval, x)

    # Training path (kernel executes the scaling)
    y_train = module(x, training=True, key=k_drop)
    jax.block_until_ready(y_train)
    assert y_train.shape == x.shape and y_train.dtype == x.dtype

    # Pure-JAX reference with the same randomness for a correctness check.
    keep_prob = 1.0 - module.drop_prob
    r = jax.random.uniform(k_drop, (B,), dtype=jnp.float32)
    mask = jnp.floor(keep_prob + r).reshape(B, 1, 1)
    y_ref = x / keep_prob * mask
    assert jnp.allclose(y_train, y_ref, atol=1e-5, rtol=1e-5)

    print("KERNEL_OK")
</pallas_src>

<mosaic_0001>
module attributes {stable_mosaic.version = 11 : i64} {
  func.func @_drop_path_kernel(%arg0: i32, %arg1: i32, %arg2: memref<2x1xf32, #tpu.memory_space<vmem>>, %arg3: memref<2x256xf32, #tpu.memory_space<vmem>>, %arg4: memref<2x256xf32, #tpu.memory_space<vmem>>) attributes {dimension_semantics = [#tpu.dimension_semantics<parallel>, #tpu.dimension_semantics<parallel>], iteration_bounds = array<i64: 1, 1>, scalar_prefetch = 0 : i64, scratch_operands = 0 : i64, tpu.core_type = #tpu.core_type<tc>, window_params = [{transform_indices = @transform_0, window_bounds = array<i64: 2, 1>}, {transform_indices = @transform_1, window_bounds = array<i64: 2, 256>}, {transform_indices = @transform_2, window_bounds = array<i64: 2, 256>}]} {
    %c0 = arith.constant 0 : index
    %c0_0 = arith.constant 0 : index
    %0 = vector.load %arg2[%c0, %c0_0] : memref<2x1xf32, #tpu.memory_space<vmem>>, vector<2x1xf32>
    %c0_1 = arith.constant 0 : index
    %c0_2 = arith.constant 0 : index
    %1 = vector.load %arg3[%c0_1, %c0_2] : memref<2x256xf32, #tpu.memory_space<vmem>>, vector<2x256xf32>
    %2 = vector.broadcast %0 : vector<2x1xf32> to vector<2x256xf32>
    %3 = arith.mulf %1, %2 : vector<2x256xf32>
    %c0_3 = arith.constant 0 : index
    %c0_4 = arith.constant 0 : index
    %4 = vector.load %arg4[%c0_3, %c0_4] : memref<2x256xf32, #tpu.memory_space<vmem>>, vector<2x256xf32>
    tpu.vector_store %arg4[%c0_3, %c0_4], %3 {strides = array<i32>} : memref<2x256xf32, #tpu.memory_space<vmem>>, vector<2x256xf32>,
    return
  }
  func.func @transform_0(%arg0: i32, %arg1: i32) -> (i32, i32) {
    %c0_i32 = arith.constant 0 : i32
    %c0_i32_0 = arith.constant 0 : i32
    return %arg0, %c0_i32 : i32, i32
  }
  func.func @transform_1(%arg0: i32, %arg1: i32) -> (i32, i32) {
    %c0_i32 = arith.constant 0 : i32
    return %arg0, %arg1 : i32, i32
  }
  func.func @transform_2(%arg0: i32, %arg1: i32) -> (i32, i32) {
    %c0_i32 = arith.constant 0 : i32
    return %arg0, %arg1 : i32, i32
  }
}

</mosaic_0001>

<bundles_post_ra>
// kernel: tpu_custom_call.1
= control target key start
LH: loop header
LB: loop body
LE: loop exit
PB: predicated region body
PF: predicated region fallthrough
CT: control target
= control target key end

     0   :  { %7 = vsyncpa [#allocation3], 0  ;;  %s154_s0 = inlined_call_operand.vmem [shape: f32[2,1], index: 0, kind: input, shape index: {}]   ;;  %s155_s1 = inlined_call_operand.hbm [shape: f32[2,256], index: 1, kind: input, shape index: {}, may-alias: {1,2}]   ;;  %s156_s2 = inlined_call_operand.hbm [shape: f32[2,256], index: 2, kind: output, shape index: {}, may-alias: {1,2}]  }
   0x1   :  { %8 = vsyncpa [#allocation4], 0  ;;  %s108_s9 = smov [#allocation2]   ;;  %s60_s13 = scalar_lea.hbm %s155_s1, 64 }
   0x2   :  { %s17_s10 = sshll.u32 %s108_s9, 4  ;;  %p61_p0 = scmp.ne.s32.totalorder %s155_s1, %s60_s13  ;;  %s18_s10 = int_to_ptr.vmem [resolvable:$true] %s17_s10 }
   0x3   :  { %p64_p1 = scmp.lt.u32.totalorder %s60_s13, %s155_s1 }
   0x5   :  { %p66_p2 = pnand %p64_p1, %p61_p0 }
   0x7   :  { %69 = shalt.err (!%p66_p2)
}
   0x8   :  { %s70_s18 = scalar_lea.vmem %s18_s10, 64  ;;  %p75_p4 = scmp.lt.s32.totalorder %s18_s10, %s18_s10 }
   0x9   :  { %p71_p3 = scmp.ne.s32.totalorder %s18_s10, %s70_s18  ;;  %p76_p5 = scmp.lt.s32.totalorder %s70_s18, %s70_s18 }
   0xb   :  { %p77_p6 = por %p76_p5, %p75_p4 }
   0xd   :  { %p78_p7 = pnand %p77_p6, %p71_p3 }
   0xf   :  { %81 = shalt.err (!%p78_p7)
}
  0x10   :  { %20 = dma.hbm_to_vmem [thread:$0]  %s155_s1, 64, %s18_s10, [#allocation3]  }
  0x11   :  { %104 = dma.done.wait [#allocation3], 64  }
  0x12   :  { %105 = vsyncadd [#allocation3], 4294967232  ;;  %v109_v0 = vmov 0   ;;  %v24_v1 = vld [vmem:[%s154_s0] sm:$0x3]  ;;  %v33_v4 = vlaneseq  ;;  %s111_s23 = smov [#allocation5]  }
  0x13   :  { %59 = vset.pattern.permute.xlu0 %v109_v0  ;;  %v110_v2 = vmov 269488144   ;;  %v25_v8 = vld [vmem:[#allocation2] sm:$0xf]  ;;  %s46_s24 = sshll.u32 %s111_s23, 4  ;;  %s47_s24 = int_to_ptr.vmem [resolvable:$true] %s46_s24 }
  0x14   :  { %28 = vperm.xlu0 %59, %v24_v1   ;;  %v31_v3 = vunpack.c.l.s4 %v110_v2  ;;  %v34_v6 = vshrl.u32 %v33_v4, 7  ;;  %s82_s1 = scalar_lea.vmem %s47_s24, 64  ;;  %p87_p9 = scmp.lt.s32.totalorder %s47_s24, %s47_s24 }
  0x15   :  { %p83_p8 = scmp.ne.s32.totalorder %s47_s24, %s82_s1  ;;  %p88_p10 = scmp.lt.s32.totalorder %s82_s1, %s82_s1 }
  0x16   :  { %v32_v5 = vunpack.c.0.s8 %v31_v3 }
  0x17   :  { %p89_p11 = por %p88_p10, %p87_p9 }
  0x18   :  { %v35_v7 = vsub.s32 %v32_v5, %v34_v6 }
  0x19   :  { %p90_p12 = pnand %p89_p11, %p83_p8 }
  0x93   :  { %v29_v9 = vpop.permute.xlu0 %28 }
  0x94   :  { %v36_v10 = vrot.slane %v29_v9, %v35_v7 }
  0x96   :  { %v38_v11 = vmul.f32 %v36_v10, %v25_v8 }
  0x98   :  { %39 = vst [vmem:[#allocation5] sm:$0xf] %v38_v11 }
  0x99   :  { %93 = shalt.err (!%p90_p12)
}
  0x9a   :  { %s94_s26 = scalar_lea.hbm %s156_s2, 64 }
  0x9b   :  { %p95_p13 = scmp.ne.s32.totalorder %s156_s2, %s94_s26  ;;  %p98_p0 = scmp.lt.u32.totalorder %s94_s26, %s156_s2 }
  0x9d   :  { %p100_p1 = pnand %p98_p0, %p95_p13 }
  0x9f   :  { %103 = shalt.err (!%p100_p1)
}
  0xa0   :  { %49 = dma.vmem_to_hbm [thread:$0]  %s47_s24, 64, %s156_s2, [#allocation4]  }
  0xa1   :  { %106 = dma.done.wait [#allocation4], 64  }
  0xa2   :  { %107 = vsyncadd [#allocation4], 4294967232 }
  0xa3   :  { %53 = vsyncpa [#allocation3], 1 }
  0xa4   :  { %54 = vsyncpa [#allocation4], 1 }

</bundles_post_ra>
